<compile_context>
chip_gen: v5e
topology: v5e:2x2
jax: 0.10.0
libtpu: 0.0.40
codegen_flags: <defaults>
</compile_context>

<pallas_src>
import functools

import numpy as np
import jax
import jax.numpy as jnp
from jax.experimental import pallas as pl
from jax.experimental.pallas import tpu as pltpu


def _decoder_kernel(*refs, n_stages, K, neg_slope):
    # refs = (x_ref, [P0, W0, b0, P1, W1, b1, ...], o_ref)
    x_ref = refs[0]
    o_ref = refs[-1]
    stage_refs = refs[1:-1]

    h = x_ref[...].astype(jnp.float32)                     # (C0, L0)
    for i in range(n_stages):
        p_ref = stage_refs[3 * i + 0]                      # (L_in, L_pad)   bf16
        w_ref = stage_refs[3 * i + 1]                      # (C_out, K*C_in) bf16
        b_ref = stage_refs[3 * i + 2]                      # (C_out, 1)      f32

        P = p_ref[...]
        W = w_ref[...]
        b = b_ref[...]
        L_pad = P.shape[1]
        L_out = L_pad - K + 1

        # Fused nearest-2x upsample + reflection pad as one 0/1 matmul (MXU).
        y = jnp.dot(h.astype(jnp.bfloat16), P,
                    preferred_element_type=jnp.float32).astype(jnp.bfloat16)

        # im2col: K lane-shifted views stacked along the contraction (sublane)
        # axis -> one deep matmul instead of 7 shallow ones.
        xcol = jnp.concatenate([y[:, k:k + L_out] for k in range(K)], axis=0)

        out = jnp.dot(W, xcol, preferred_element_type=jnp.float32) + b
        if i != n_stages - 1:
            out = jnp.where(out >= 0.0, out, neg_slope * out)   # LeakyReLU(0.2)
        # TODO(synk): nn.Dropout(p=0.2) after stages 0/1 is identity at inference.
        h = out

    o_ref[...] = h.astype(o_ref.dtype)


def decoder_forward(x_ncl, kernel_params, kernel_size):
    """x_ncl: (N, C0, L0) PyTorch NCL layout. Returns (N, C_last, L0 * 2^n_stages)."""
    N, C0, L0 = x_ncl.shape
    K = kernel_size
    n_stages = len(kernel_params)

    flat_params = []
    in_specs = [pl.BlockSpec((None, C0, L0), lambda n: (n, 0, 0))]
    L = L0
    C_out = C0
    for (P, W, b) in kernel_params:
        flat_params += [P, W, b]
        # Constant index_maps: weights are DMA'd once and stay resident across
        # the batch grid (do not make these grid-dependent).
        in_specs += [
            pl.BlockSpec(P.shape, lambda n: (0, 0)),
            pl.BlockSpec(W.shape, lambda n: (0, 0)),
            pl.BlockSpec(b.shape, lambda n: (0, 0)),
        ]
        L = 2 * L
        C_out = W.shape[0]

    kernel = functools.partial(
        _decoder_kernel, n_stages=n_stages, K=K, neg_slope=0.2
    )

    return pl.pallas_call(
        kernel,
        out_shape=jax.ShapeDtypeStruct((N, C_out, L), x_ncl.dtype),
        grid_spec=pltpu.PrefetchScalarGridSpec(
            num_scalar_prefetch=0,
            grid=(N,),
            in_specs=in_specs,
            out_specs=pl.BlockSpec((None, C_out, L), lambda n: (n, 0, 0)),
        ),
        compiler_params=pltpu.CompilerParams(dimension_semantics=("parallel",)),
    )(x_ncl, *flat_params)


def _upsample_reflectpad_matrix(L_in, pad):
    """0/1 matrix P (L_in, 2*L_in + 2*pad): (x @ P) == ReflectionPad1d(pad)(Upsample2x(x))."""
    L_up = 2 * L_in
    L_pad = L_up + 2 * pad
    P = np.zeros((L_in, L_pad), np.float32)
    for m in range(L_pad):
        j = m - pad
        if j < 0:
            j = -j                          # reflect (edge not repeated)
        elif j >= L_up:
            j = 2 * (L_up - 1) - j
        P[j // 2, m] = 1.0                  # nearest-neighbor 2x: src = j // 2
    return P


def init_decoder_params(key, channels, kernel_size):
    """PyTorch-layout Conv1d params: w (C_out, C_in, K), b (C_out,), uniform(-bound, bound)."""
    params = []
    for i in range(len(channels) - 1):
        c_in, c_out = channels[i], channels[i + 1]
        key, kw, kb = jax.random.split(key, 3)
        bound = 1.0 / np.sqrt(c_in * kernel_size)
        w = jax.random.uniform(kw, (c_out, c_in, kernel_size), jnp.float32, -bound, bound)
        b = jax.random.uniform(kb, (c_out,), jnp.float32, -bound, bound)
        params.append((w, b))
    return params


def pack_kernel_params(torch_params, kernel_size, L0):
    """Host-side repack: fold upsample+pad into P, im2col-reshape weights, cast to bf16."""
    pad = (kernel_size - 1) // 2
    packed = []
    L = L0
    for (w, b) in torch_params:
        c_out, c_in, K = w.shape
        P = jnp.asarray(_upsample_reflectpad_matrix(L, pad), jnp.bfloat16)
        # W2[c_out, k*C_in + c_in] = w[c_out, c_in, k]  (matches im2col row order)
        W2 = jnp.transpose(w, (0, 2, 1)).reshape(c_out, K * c_in).astype(jnp.bfloat16)
        b2 = b.reshape(c_out, 1).astype(jnp.float32)
        packed.append((P, W2, b2))
        L = 2 * L
    return packed


def decoder_reference(x_ncl, torch_params, kernel_size):
    """Pure-JAX reference (f32) mirroring the PyTorch module, for correctness check."""
    pad = (kernel_size - 1) // 2
    n_stages = len(torch_params)
    x = x_ncl
    for i, (w, b) in enumerate(torch_params):
        x = jnp.repeat(x, 2, axis=2)                                   # Upsample 2x nearest
        left = x[:, :, 1:pad + 1][:, :, ::-1]                          # ReflectionPad1d
        right = x[:, :, -pad - 1:-1][:, :, ::-1]
        xp = jnp.concatenate([left, x, right], axis=2)
        K = w.shape[2]
        L_out = xp.shape[2] - K + 1
        xcol = jnp.stack([xp[:, :, k:k + L_out] for k in range(K)], axis=1)  # (N,K,Cin,Lout)
        out = jnp.einsum("nkcl,ock->nol", xcol, w) + b[None, :, None]  # Conv1d 'valid'
        if i != n_stages - 1:
            out = jnp.where(out >= 0.0, out, 0.2 * out)                # LeakyReLU(0.2)
        x = out
    return x


if __name__ == "__main__":
    channels = [32, 16, 8]   # small decoder: 32 -> 16 -> 8 channels
    kernel_size = 7
    N, L0 = 2, 8

    key = jax.random.PRNGKey(0)
    key, kx = jax.random.split(key)
    x = jax.random.normal(kx, (N, channels[0], L0), jnp.float32)  # NCL input

    torch_params = init_decoder_params(key, channels, kernel_size)
    kparams = pack_kernel_params(torch_params, kernel_size, L0)

    out = decoder_forward(x, kparams, kernel_size)
    out = jax.block_until_ready(out)

    expected_shape = (N, channels[-1], L0 * 2 ** (len(channels) - 1))
    assert out.shape == expected_shape, (out.shape, expected_shape)
    assert bool(jnp.all(jnp.isfinite(out)))

    ref = decoder_reference(x, torch_params, kernel_size)
    max_err = float(jnp.max(jnp.abs(out - ref)))
    assert bool(jnp.allclose(out, ref, rtol=5e-2, atol=5e-2)), max_err

    print("KERNEL_OK")
</pallas_src>

<mosaic_0001>
module attributes {stable_mosaic.version = 11 : i64} {
  func.func @_decoder_kernel(%arg0: i32, %arg1: memref<1x32x8xf32, #tpu.memory_space<vmem>>, %arg2: memref<8x22xbf16, #tpu.memory_space<vmem>>, %arg3: memref<16x224xbf16, #tpu.memory_space<vmem>>, %arg4: memref<16x1xf32, #tpu.memory_space<vmem>>, %arg5: memref<16x38xbf16, #tpu.memory_space<vmem>>, %arg6: memref<8x112xbf16, #tpu.memory_space<vmem>>, %arg7: memref<8x1xf32, #tpu.memory_space<vmem>>, %arg8: memref<1x8x32xf32, #tpu.memory_space<vmem>>) attributes {dimension_semantics = [#tpu.dimension_semantics<parallel>], iteration_bounds = array<i64: 2>, scalar_prefetch = 0 : i64, scratch_operands = 0 : i64, tpu.core_type = #tpu.core_type<tc>, window_params = [{transform_indices = @transform_0, window_bounds = array<i64: 1, 32, 8>}, {pipeline_mode = #tpu.pipeline_mode<synchronous>, transform_indices = @transform_1, window_bounds = array<i64: 8, 22>}, {pipeline_mode = #tpu.pipeline_mode<synchronous>, transform_indices = @transform_2, window_bounds = array<i64: 16, 224>}, {pipeline_mode = #tpu.pipeline_mode<synchronous>, transform_indices = @transform_3, window_bounds = array<i64: 16, 1>}, {pipeline_mode = #tpu.pipeline_mode<synchronous>, transform_indices = @transform_4, window_bounds = array<i64: 16, 38>}, {pipeline_mode = #tpu.pipeline_mode<synchronous>, transform_indices = @transform_5, window_bounds = array<i64: 8, 112>}, {pipeline_mode = #tpu.pipeline_mode<synchronous>, transform_indices = @transform_6, window_bounds = array<i64: 8, 1>}, {transform_indices = @transform_7, window_bounds = array<i64: 1, 8, 32>}]} {
    %c0 = arith.constant 0 : index
    %c0_0 = arith.constant 0 : index
    %c0_1 = arith.constant 0 : index
    %0 = vector.load %arg1[%c0, %c0_0, %c0_1] : memref<1x32x8xf32, #tpu.memory_space<vmem>>, vector<1x32x8xf32>
    %1 = vector.shape_cast %0 : vector<1x32x8xf32> to vector<32x8xf32>
    %c0_2 = arith.constant 0 : index
    %c0_3 = arith.constant 0 : index
    %2 = vector.load %arg2[%c0_2, %c0_3] : memref<8x22xbf16, #tpu.memory_space<vmem>>, vector<8x22xbf16>
    %c0_4 = arith.constant 0 : index
    %c0_5 = arith.constant 0 : index
    %3 = vector.load %arg3[%c0_4, %c0_5] : memref<16x224xbf16, #tpu.memory_space<vmem>>, vector<16x224xbf16>
    %c0_6 = arith.constant 0 : index
    %c0_7 = arith.constant 0 : index
    %4 = vector.load %arg4[%c0_6, %c0_7] : memref<16x1xf32, #tpu.memory_space<vmem>>, vector<16x1xf32>
    %5 = arith.truncf %1 : vector<32x8xf32> to vector<32x8xbf16>
    %cst = arith.constant dense<0.000000e+00> : vector<32x22xf32>
    %6 = tpu.matmul %5, %2, %cst {dimension_numbers = #tpu.dot_dimension_numbers<[1], [0], [0], [1], [0, 0, 1, 1], [], []>} : vector<32x8xbf16>, vector<8x22xbf16>, vector<32x22xf32> -> vector<32x22xf32>
    %7 = arith.truncf %6 : vector<32x22xf32> to vector<32x22xbf16>
    %8 = vector.extract_strided_slice %7 {offsets = [0, 0], sizes = [32, 16], strides = [1, 1]} : vector<32x22xbf16> to vector<32x16xbf16>
    %9 = vector.extract_strided_slice %7 {offsets = [0, 1], sizes = [32, 16], strides = [1, 1]} : vector<32x22xbf16> to vector<32x16xbf16>
    %10 = vector.extract_strided_slice %7 {offsets = [0, 2], sizes = [32, 16], strides = [1, 1]} : vector<32x22xbf16> to vector<32x16xbf16>
    %11 = vector.extract_strided_slice %7 {offsets = [0, 3], sizes = [32, 16], strides = [1, 1]} : vector<32x22xbf16> to vector<32x16xbf16>
    %12 = vector.extract_strided_slice %7 {offsets = [0, 4], sizes = [32, 16], strides = [1, 1]} : vector<32x22xbf16> to vector<32x16xbf16>
    %13 = vector.extract_strided_slice %7 {offsets = [0, 5], sizes = [32, 16], strides = [1, 1]} : vector<32x22xbf16> to vector<32x16xbf16>
    %14 = vector.extract_strided_slice %7 {offsets = [0, 6], sizes = [32, 16], strides = [1, 1]} : vector<32x22xbf16> to vector<32x16xbf16>
    %15 = tpu.concatenate %8, %9, %10, %11, %12, %13, %14 in 0 : vector<32x16xbf16>, vector<32x16xbf16>, vector<32x16xbf16>, vector<32x16xbf16>, vector<32x16xbf16>, vector<32x16xbf16>, vector<32x16xbf16> -> vector<224x16xbf16>
    %cst_8 = arith.constant dense<0.000000e+00> : vector<16x16xf32>
    %16 = tpu.matmul %3, %15, %cst_8 {dimension_numbers = #tpu.dot_dimension_numbers<[1], [0], [0], [1], [0, 0, 1, 1], [], []>} : vector<16x224xbf16>, vector<224x16xbf16>, vector<16x16xf32> -> vector<16x16xf32>
    %17 = vector.broadcast %4 : vector<16x1xf32> to vector<16x16xf32>
    %18 = arith.addf %16, %17 : vector<16x16xf32>
    %cst_9 = arith.constant 0.000000e+00 : f32
    %19 = vector.broadcast %cst_9 : f32 to vector<16x16xf32>
    %20 = arith.cmpf oge, %18, %19 : vector<16x16xf32>
    %cst_10 = arith.constant 2.000000e-01 : f32
    %21 = vector.broadcast %cst_10 : f32 to vector<16x16xf32>
    %22 = arith.mulf %21, %18 : vector<16x16xf32>
    %23 = arith.select %20, %18, %22 : vector<16x16xi1>, vector<16x16xf32>
    %c0_11 = arith.constant 0 : index
    %c0_12 = arith.constant 0 : index
    %24 = vector.load %arg5[%c0_11, %c0_12] : memref<16x38xbf16, #tpu.memory_space<vmem>>, vector<16x38xbf16>
    %c0_13 = arith.constant 0 : index
    %c0_14 = arith.constant 0 : index
    %25 = vector.load %arg6[%c0_13, %c0_14] : memref<8x112xbf16, #tpu.memory_space<vmem>>, vector<8x112xbf16>
    %c0_15 = arith.constant 0 : index
    %c0_16 = arith.constant 0 : index
    %26 = vector.load %arg7[%c0_15, %c0_16] : memref<8x1xf32, #tpu.memory_space<vmem>>, vector<8x1xf32>
    %27 = arith.truncf %23 : vector<16x16xf32> to vector<16x16xbf16>
    %cst_17 = arith.constant dense<0.000000e+00> : vector<16x38xf32>
    %28 = tpu.matmul %27, %24, %cst_17 {dimension_numbers = #tpu.dot_dimension_numbers<[1], [0], [0], [1], [0, 0, 1, 1], [], []>} : vector<16x16xbf16>, vector<16x38xbf16>, vector<16x38xf32> -> vector<16x38xf32>
    %29 = arith.truncf %28 : vector<16x38xf32> to vector<16x38xbf16>
    %30 = vector.extract_strided_slice %29 {offsets = [0, 0], sizes = [16, 32], strides = [1, 1]} : vector<16x38xbf16> to vector<16x32xbf16>
    %31 = vector.extract_strided_slice %29 {offsets = [0, 1], sizes = [16, 32], strides = [1, 1]} : vector<16x38xbf16> to vector<16x32xbf16>
    %32 = vector.extract_strided_slice %29 {offsets = [0, 2], sizes = [16, 32], strides = [1, 1]} : vector<16x38xbf16> to vector<16x32xbf16>
    %33 = vector.extract_strided_slice %29 {offsets = [0, 3], sizes = [16, 32], strides = [1, 1]} : vector<16x38xbf16> to vector<16x32xbf16>
    %34 = vector.extract_strided_slice %29 {offsets = [0, 4], sizes = [16, 32], strides = [1, 1]} : vector<16x38xbf16> to vector<16x32xbf16>
    %35 = vector.extract_strided_slice %29 {offsets = [0, 5], sizes = [16, 32], strides = [1, 1]} : vector<16x38xbf16> to vector<16x32xbf16>
    %36 = vector.extract_strided_slice %29 {offsets = [0, 6], sizes = [16, 32], strides = [1, 1]} : vector<16x38xbf16> to vector<16x32xbf16>
    %37 = tpu.concatenate %30, %31, %32, %33, %34, %35, %36 in 0 : vector<16x32xbf16>, vector<16x32xbf16>, vector<16x32xbf16>, vector<16x32xbf16>, vector<16x32xbf16>, vector<16x32xbf16>, vector<16x32xbf16> -> vector<112x32xbf16>
    %cst_18 = arith.constant dense<0.000000e+00> : vector<8x32xf32>
    %38 = tpu.matmul %25, %37, %cst_18 {dimension_numbers = #tpu.dot_dimension_numbers<[1], [0], [0], [1], [0, 0, 1, 1], [], []>} : vector<8x112xbf16>, vector<112x32xbf16>, vector<8x32xf32> -> vector<8x32xf32>
    %39 = vector.broadcast %26 : vector<8x1xf32> to vector<8x32xf32>
    %40 = arith.addf %38, %39 : vector<8x32xf32>
    %c0_19 = arith.constant 0 : index
    %c0_20 = arith.constant 0 : index
    %c0_21 = arith.constant 0 : index
    %41 = vector.load %arg8[%c0_19, %c0_20, %c0_21] : memref<1x8x32xf32, #tpu.memory_space<vmem>>, vector<1x8x32xf32>
    %42 = vector.shape_cast %41 : vector<1x8x32xf32> to vector<8x32xf32>
    %43 = vector.shape_cast %40 : vector<8x32xf32> to vector<1x8x32xf32>
    tpu.vector_store %arg8[%c0_19, %c0_20, %c0_21], %43 {strides = array<i32>} : memref<1x8x32xf32, #tpu.memory_space<vmem>>, vector<1x8x32xf32>,
    return
  }
  func.func @transform_0(%arg0: i32) -> (i32, i32, i32) {
    %c0_i32 = arith.constant 0 : i32
    %c0_i32_0 = arith.constant 0 : i32
    %c0_i32_1 = arith.constant 0 : i32
    return %arg0, %c0_i32, %c0_i32_0 : i32, i32, i32
  }
  func.func @transform_1(%arg0: i32) -> (i32, i32) {
    %c0_i32 = arith.constant 0 : i32
    %c0_i32_0 = arith.constant 0 : i32
    %c0_i32_1 = arith.constant 0 : i32
    return %c0_i32, %c0_i32_0 : i32, i32
  }
  func.func @transform_2(%arg0: i32) -> (i32, i32) {
    %c0_i32 = arith.constant 0 : i32
    %c0_i32_0 = arith.constant 0 : i32
    %c0_i32_1 = arith.constant 0 : i32
    return %c0_i32, %c0_i32_0 : i32, i32
  }
  func.func @transform_3(%arg0: i32) -> (i32, i32) {
    %c0_i32 = arith.constant 0 : i32
    %c0_i32_0 = arith.constant 0 : i32
    %c0_i32_1 = arith.constant 0 : i32
    return %c0_i32, %c0_i32_0 : i32, i32
  }
  func.func @transform_4(%arg0: i32) -> (i32, i32) {
    %c0_i32 = arith.constant 0 : i32
    %c0_i32_0 = arith.constant 0 : i32
    %c0_i32_1 = arith.constant 0 : i32
    return %c0_i32, %c0_i32_0 : i32, i32
  }
  func.func @transform_5(%arg0: i32) -> (i32, i32) {
    %c0_i32 = arith.constant 0 : i32
    %c0_i32_0 = arith.constant 0 : i32
    %c0_i32_1 = arith.constant 0 : i32
    return %c0_i32, %c0_i32_0 : i32, i32
  }
  func.func @transform_6(%arg0: i32) -> (i32, i32) {
    %c0_i32 = arith.constant 0 : i32
    %c0_i32_0 = arith.constant 0 : i32
    %c0_i32_1 = arith.constant 0 : i32
    return %c0_i32, %c0_i32_0 : i32, i32
  }
  func.func @transform_7(%arg0: i32) -> (i32, i32, i32) {
    %c0_i32 = arith.constant 0 : i32
    %c0_i32_0 = arith.constant 0 : i32
    %c0_i32_1 = arith.constant 0 : i32
    return %arg0, %c0_i32, %c0_i32_0 : i32, i32, i32
  }
}

</mosaic_0001>

<bundles_post_ra>
// kernel: tpu_custom_call.1
= control target key start
LH: loop header
LB: loop body
LE: loop exit
PB: predicated region body
PF: predicated region fallthrough
CT: control target
= control target key end

     0   :  { %12 = vsyncpa [#allocation3], 0  ;;  %s915_s0 = inlined_call_operand.vmem [shape: f32[2,32,8], index: 0, kind: input, shape index: {}]   ;;  %s916_s1 = inlined_call_operand.vmem [shape: bf16[8,22], index: 1, kind: input, shape index: {}]   ;;  %s917_s2 = inlined_call_operand.vmem [shape: bf16[16,224], index: 2, kind: input, shape index: {}]   ;;  %s918_s3 = inlined_call_operand.vmem [shape: f32[16,1], index: 3, kind: input, shape index: {}]   ;;  %s919_s4 = inlined_call_operand.vmem [shape: bf16[16,38], index: 4, kind: input, shape index: {}]   ;;  %s920_s5 = inlined_call_operand.vmem [shape: bf16[8,112], index: 5, kind: input, shape index: {}]   ;;  %s921_s6 = inlined_call_operand.vmem [shape: f32[8,1], index: 6, kind: input, shape index: {}]   ;;  %s922_s7 = inlined_call_operand.hbm [shape: f32[2,8,32], index: 7, kind: output, shape index: {}]  }
   0x1   :  { %14 = vsyncpa [#allocation3 + $0x1], 0  ;;  %s773_s24 = smov 0   ;;  %s775_s25 = smov 0  }
   0x2   :  { %s777_s26 = smov 0   ;;  %s779_s27 = smov 0  }
   0x3 LB: > { %s794_s28 = sadd.s32 4294967295, %s724_s27   ;;  %s582_s29 = sadd.s32 4294967294, %s724_s27   ;;  %s724_s27 = sphi %s779_s27, %s928_s27   ;;  %s720_s26 = sphi %s777_s26, %s927_s26   ;;  %s716_s25 = sphi %s775_s25, %s926_s25   ;;  %s712_s24 = sphi %s773_s24, %s925_s24  }
   0x4   : > { %s798_s30 = sadd.s32 1, %s724_s27   ;;  %s179_s8 = sadd.s32 1, %s720_s26 }
   0x5   : > { %s176_s9 = ssub.s32 %s724_s27, %s798_s30  ;;  %p189_p0 = scmp.ne.s32.totalorder %s720_s26, %s716_s25 }
   0x6   : > { %p177_p1 = scmp.eq.s32.totalorder %s176_s9, 0  ;;  %p190_p2 = scmp.eq.s32.totalorder %s794_s28, 1 }
   0x7   : > { %p195_p3 = scmp.ne.s32.totalorder %s716_s25, %s712_s24  ;;  %p196_p4 = scmp.eq.s32.totalorder %s582_s29, 1 }
   0x8   : > { %s809_s10 = scalar_select %p177_p1, %s720_s26, %s179_s8  }
   0x9   : > { %p811_p5 = por %p190_p2, %p189_p0  ;;  %p815_p6 = por %p196_p4, %p195_p3 }
   0xa   : > { %p585_p7 = scmp.ge.s32.totalorder %s724_s27, 1  ;;  %p240_p8 = scmp.lt.s32.totalorder %s724_s27, 3 }
   0xc   : > { %p241_p9 = pnand %p585_p7, %p240_p8 }
   0xd   : > { %p272_p10 = scmp.lt.s32.totalorder (!%p241_p9), %s794_s28, 1  ;;  %s726_s20 = smov (!%p241_p9), 122  }
   0xe   : > { %244 = sbr.rel (%p241_p9) target bundleno = 900 (0x384), region = 48  ;;  %s727_s21 = smov (!%p241_p9), 126  }
   0xf   : > { %s728_s22 = smov (!%p241_p9), 123   ;;  %s729_s23 = smov (!%p241_p9), 125  }
  0x10   : > { %s730_s29 = smov (!%p241_p9), 124   ;;  %s731_s8 = smov (!%p241_p9), 127  }
  0x13   : > { %v282_v0 = vld [vmem:[%s916_s1] sm:$0xf]  ;;  %vm296_vm0 = vcmask 1043456   ;;  %s273_s15 = scalar_select %p272_p10, %s794_s28, 1  ;;  %vm289_vm1 = vcmask 64512   ;;  %v286_v26 = vld [vmem:[%s918_s3 + $0x8] sm:$0xff] }
  0x14   : > { %v298_v1 = vsel %vm296_vm0, %v282_v0, 0  ;;  %v285_v25 = vld [vmem:[%s918_s3] sm:$0xff]  ;;  %v732_v27 = vmov 0   ;;  %v595_v37 = vld [vmem:[%s917_s2 + $0x8] sm:$0xf0]  ;;  %vm390_vm2 = vcmask 785408  }
  0x15   : > { %307 = vmatpush.bf16.msra.mxu0 %v298_v1  ;;  %s610_s16 = sshll.u32 %s273_s15, 5  ;;  %660 = vset.pattern.permute.xlu0 %v732_v27  ;;  %v611_v36 = vld [vmem:[%s917_s2 + $0x4] sm:$0xf]  ;;  %v593_v40 = vld [vmem:[%s917_s2] sm:$0xf]  ;;  %vm439_vm5 = vcmask 130048  }
  0x16   : > { %s276_s19 = scalar_lea.vmem %s915_s0, %s610_s16  ;;  %661 = vset.pattern.permute.xlu1 %v732_v27  ;;  %v598_v39 = vor.u32 %v611_v36, %v595_v37  ;;  %v612_v41 = vld [vmem:[%s917_s2 + $0x4] sm:$0xf0]  ;;  %v613_v43 = vld [vmem:[%s919_s4] sm:$0xff]  ;;  %vm488_vm6 = vcmask 916480   ;;  %vm505_vm7 = vcmask 261120  }
  0x17   : > { %v278_v2 = vld [vmem:[%s276_s19] sm:$0xff]  ;;  %v279_v3 = vld [vmem:[%s276_s19 + $0x8] sm:$0xff]  ;;  %v280_v5 = vld [vmem:[%s276_s19 + $0x10] sm:$0xff]  ;;  %v594_v42 = vor.u32 %v612_v41, %v593_v40  ;;  %450 = vmatpush.bf16.msra.mxu3 %v613_v43 }
  0x18   : > { %v287_v4 = vpack.c.bf16 %v279_v3, %v278_v2  ;;  %v281_v6 = vld [vmem:[%s276_s19 + $0x18] sm:$0xff]  ;;  %v431_v2 = vld [vmem:[%s921_s6] sm:$0xff] }
  0x19   : > { %v288_v7 = vpack.c.bf16 %v281_v6, %v280_v5 }
  0x1a   : > { %589 = vmatmul.msk.bf16.vlgmr.msra.gmra.mxu0 %vm289_vm1, %v287_v4 }
  0x2a   : > { %590 = vmatmul.msk.bf16.gmra.mxu0 %vm289_vm1, %v288_v7 }
  0x97   : > { %v309_v8 = vpop.f32.mrf.mxu0 }
  0x98   : > { %v319_v9 = vpack.c.bf16 %v309_v8, %v309_v8 }
  0x9a   : > { %v327_v12 = vunpack.c.l.b16 %v319_v9  ;;  %v430_v9 = vld [vmem:[%s920_s5] sm:$0xf] }
  0x9f   : > { %v311_v10 = vpop.f32.mrf.mxu0 }
  0xa0   : > { %v320_v11 = vpack.c.bf16 %v311_v10, %v311_v10 }
  0xa2   : > { %v328_v13 = vunpack.c.l.b16 %v320_v11 }
  0xa4   : > { %v829_v14 = vpack.c.b16 %v328_v13, %v327_v12 }
  0xa6   : > { %365 = vrot.lane.b32.xlu2 %v829_v14, %s726_s20 }
  0xa7   : > { %v314_v15 = vpop.f32.mrf.mxu0 }
  0xa8   : > { %v321_v16 = vpack.c.bf16 %v314_v15, %v314_v15 }
  0xaa   : > { %v329_v19 = vunpack.c.l.b16 %v321_v16 }
  0xae   : > { %341 = vrot.lane.b32.xlu2 %v829_v14, %s727_s21 }
  0xaf   : > { %v316_v17 = vpop.f32.mrf.mxu0 }
  0xb0   : > { %v322_v18 = vpack.c.bf16 %v316_v17, %v316_v17 }
  0xb2   : > { %v330_v20 = vunpack.c.l.b16 %v322_v18 }
  0xb4   : > { %v332_v21 = vpack.c.b16 %v330_v20, %v329_v19 }
  0xb6   : > { %359 = vrot.lane.b32.xlu2 %v829_v14, %s728_s22  ;;  %367 = vrot.lane.b32.xlu1 %v332_v21, %s726_s20 }
  0xb7   : > { %349 = vrot.lane.b32.xlu0 %v332_v21, %s729_s23 }
  0xbe   : > { %353 = vrot.lane.b32.xlu2 %v829_v14, %s730_s29  ;;  %343 = vrot.lane.b32.xlu1 %v332_v21, %s727_s21 }
  0xbf   : > { %347 = vrot.lane.b32.xlu0 %v829_v14, %s729_s23 }
  0xc6   : > { %337 = vrot.lane.b32.xlu1 %v332_v21, %s731_s8 }
  0xc7   : > { %361 = vrot.lane.b32.xlu0 %v332_v21, %s728_s22 }
  0xce   : > { %355 = vrot.lane.b32.xlu1 %v332_v21, %s730_s29 }
  0xcf   : > { %335 = vrot.lane.b32.xlu0 %v829_v14, %s731_s8 }
  0xd6   : > { %378 = vperm.xlu1 %661, %v286_v26  }
  0xd7   : > { %373 = vperm.xlu0 %660, %v285_v25  }
 0x100   : > { %v366_v22 = vpop.permute.xlu2 %365 }
 0x108   : > { %v342_v29 = vpop.permute.xlu2 %341 }
 0x110   : > { %v360_v33 = vpop.permute.xlu2 %359 }
 0x118   : > { %v354_v38 = vpop.permute.xlu2 %353 }
 0x128   : > { %v368_v23 = vpop.permute.xlu1 %367 }
 0x129   : > { %v350_v24 = vpop.permute.xlu0 %349  ;;  %410 = vmatpush.bf16.msra.mxu2 %v368_v23 }
 0x12a   : > { %394 = vmatpush.bf16.msra.mxu1 %v350_v24 }
 0x12d   : > { %411 = vmatpush.bf16.msra.mxu2 %v366_v22 }
 0x130   : > { %v344_v28 = vpop.permute.xlu1 %343 }
 0x131   : > { %v348_v30 = vpop.permute.xlu0 %347 }
 0x132   : > { %395 = vmatpush.bf16.msra.mxu1 %v348_v30 }
 0x136   : > { %396 = vmatpush.bf16.msra.mxu1 %v344_v28 }
 0x138   : > { %v338_v31 = vpop.permute.xlu1 %337 }
 0x139   : > { %v362_v32 = vpop.permute.xlu0 %361 }
 0x13a   : > { %397 = vmatpush.bf16.msra.mxu1 %v342_v29  ;;  %412 = vmatpush.bf16.msra.mxu2 %v362_v32 }
 0x13e   : > { %398 = vmatpush.bf16.msra.mxu1 %v338_v31  ;;  %413 = vmatpush.bf16.msra.mxu2 %v360_v33 }
 0x140   : > { %v356_v34 = vpop.permute.xlu1 %355 }
 0x141   : > { %v336_v35 = vpop.permute.xlu0 %335 }
 0x142   : > { %399 = vmatpush.bf16.msra.mxu1 %v336_v35  ;;  %414 = vmatpush.bf16.msra.mxu2 %v356_v34 }
 0x146   : > { %400 = vmatpush.bf16.msra.mxu1 %v332_v21  ;;  %415 = vmatpush.bf16.msra.mxu2 %v354_v38 }
 0x148   : > { %v379_v48 = vpop.permute.xlu1 %378 }
 0x149   : > { %599 = vmatmul.msk.bf16.vlgmr.msra.gmra.mxu2 %vm390_vm2, %v598_v39  ;;  %v374_v45 = vpop.permute.xlu0 %373 }
 0x14a   : > { %401 = vmatpush.bf16.msra.mxu1 %v829_v14 }
 0x14d   : > { %402 = vmatmul.bf16.vlgmr.msra.gmra.mxu1 %v594_v42 }
 0x1ca   : > { %v403_v44 = vpop.f32.mrf.mxu1 }
 0x1cb   : > { %v404_v47 = vadd.f32 %v403_v44, %v374_v45 }
 0x1cc   : > { %v417_v46 = vpop.f32.mrf.mxu2 }
 0x1cd   : > { %v418_v49 = vadd.f32 %v417_v46, %v404_v47 }
 0x1cf   : > { %v424_v53 = vmul.f32 0.2, %v418_v49  ;;  %vm422_vm3 = vcmp.ge.f32.partialorder %v418_v49, 0.0 }
 0x1d1   : > { %v426_v56 = vsel %vm422_vm3, %v418_v49, %v424_v53 }
 0x1d2   : > { %v405_v50 = vpop.f32.mrf.mxu1 }
 0x1d3   : > { %v406_v51 = vadd.f32 %v405_v50, %v379_v48 }
 0x1d4   : > { %v419_v52 = vpop.f32.mrf.mxu2 }
 0x1d5   : > { %v420_v54 = vadd.f32 %v419_v52, %v406_v51 }
 0x1d7   : > { %vm423_vm4 = vcmp.ge.f32.partialorder %v420_v54, 0.0  ;;  %v425_v55 = vmul.f32 0.2, %v420_v54 }
 0x1d9   : > { %v427_v57 = vsel %vm423_vm4, %v420_v54, %v425_v55 }
 0x1da   : > { %v432_v58 = vpack.c.bf16 %v427_v57, %v426_v56 }
 0x1dc   : > { %604 = vmatmul.msk.bf16.vlgmr.msra.gmra.mxu3 %vm439_vm5, %v432_v58 }
 0x25f   : > { %v452_v59 = vpop.f32.mrf.mxu3 }
 0x260   : > { %v457_v60 = vpack.c.bf16 %v452_v59, %v452_v59 }
 0x262   : > { %v461_v63 = vunpack.c.l.b16 %v457_v60 }
 0x267   : > { %v454_v61 = vpop.f32.mrf.mxu3 }
 0x268   : > { %v458_v62 = vpack.c.bf16 %v454_v61, %v454_v61 }
 0x26a   : > { %v462_v0 = vunpack.c.l.b16 %v458_v62 }
 0x26c   : > { %v463_v1 = vpack.c.b16 %v462_v0, %v461_v63 }
 0x26e   : > { %471 = vrot.lane.b32.xlu0 %v463_v1, %s729_s23  ;;  %477 = vrot.lane.b32.xlu1 %v463_v1, %s728_s22  ;;  %s269_s22 = sand.u32 1, %s716_s25   ;;  %s607_s23 = sshll.u32 %s794_s28, 3 }
 0x26f   : > { %480 = vrot.lane.b32.xlu2 %v463_v1, %s726_s20  ;;  %s518_s13 = scalar_lea.hbm %s922_s7, %s607_s23  ;;  %s508_s17 = scalar_lea.sflag [#allocation3], %s269_s22 }
 0x270   : > { %s522_s16 = sshll.u32 %s518_s13, 4  ;;  %s523_s16 = int_to_ptr.hbm [resolvable:$true] %s522_s16 }
 0x271   : > { %s676_s18 = sshra.s32 %s523_s16, 4  ;;  %s677_s18 = int_to_ptr.hbm [resolvable:$true] %s676_s18 }
 0x272   : > { %s678_s28 = scalar_lea.hbm %s677_s18, 8  ;;  %p683_p0 = scmp.lt.s32.totalorder %s677_s18, %s922_s7 }
 0x273   : > { %p679_p11 = scmp.ne.s32.totalorder %s677_s18, %s678_s28 }
 0x275   : > { %p680_p12 = pnand %p679_p11, %p811_p5 }
 0x276   : > { %485 = vperm.xlu0 %660, %v431_v2   ;;  %468 = vrot.lane.b32.xlu1 %v463_v1, %s727_s21  ;;  %s682_s21 = scalar_lea.hbm %s922_s7, 16 }
 0x277   : > { %474 = vrot.lane.b32.xlu2 %v463_v1, %s730_s29  ;;  %s586_s29 = sshll.u32 %s269_s22, 3  ;;  %p681_p13 = pneg %p680_p12 }
 0x278   : > { %s271_s14 = scalar_lea.vmem [#allocation2], %s586_s29  ;;  %p684_p1 = scmp.lt.s32.totalorder %s682_s21, %s678_s28 }
 0x279   : > { %s520_s15 = sshll.u32 %s271_s14, 4  ;;  %s521_s15 = int_to_ptr.vmem [resolvable:$true] %s520_s15 }
 0x27a   : > { %p685_p2 = por %p684_p1, %p683_p0 }
 0x27c   : > { %p686_p3 = pnand %p685_p2, %p681_p13 }
 0x27f   : > { %465 = vrot.lane.b32.xlu2 %v463_v1, %s731_s8 }
 0x2c9   : > { %v481_v3 = vpop.permute.xlu2 %480 }
 0x2ca   : > { %493 = vmatpush.bf16.msrb.mxu3 %v481_v3 }
 0x2d1   : > { %v475_v5 = vpop.permute.xlu2 %474 }
 0x2d9   : > { %v466_v8 = vpop.permute.xlu2 %465 }
 0x2e0   : > { %v478_v4 = vpop.permute.xlu1 %477  ;;  %v472_v6 = vpop.permute.xlu0 %471 }
 0x2e1   : > { %494 = vmatpush.bf16.msrb.mxu3 %v478_v4 }
 0x2e5   : > { %495 = vmatpush.bf16.msrb.mxu3 %v475_v5 }
 0x2e8   : > { %v469_v7 = vpop.permute.xlu1 %468  ;;  %v486_v10 = vpop.permute.xlu0 %485 }
 0x2e9   : > { %496 = vmatpush.bf16.msrb.mxu3 %v472_v6 }
 0x2ed   : > { %497 = vmatpush.bf16.msrb.mxu3 %v469_v7 }
 0x2f1   : > { %498 = vmatpush.bf16.msrb.mxu3 %v466_v8 }
 0x2f5   : > { %499 = vmatpush.bf16.msrb.mxu3 %v463_v1 }
 0x2f8   : > { %605 = vmatmul.msk.bf16.vlgmr.msrb.gmra.mxu3 %vm488_vm6, %v430_v9 }
 0x37b   : > { %v501_v11 = vpop.f32.mrf.mxu3 }
 0x37c   : > { %v502_v12 = vadd.f32 %v501_v11, %v486_v10 }
 0x37e   : > { %506 = vst.msk [vmem:[%s271_s14] sm:$0xff] %vm505_vm7, %v502_v12 }
 0x37f   : > { %689 = shalt.err (!%p686_p3)
}
 0x380   : > { %614 = dma.vmem_to_hbm [thread:$0]  (%p811_p5), %s521_s15, 128, %s523_s16, %s508_s17  }
 0x383   : > { %v503_v13 = vpop.f32.mrf.mxu3 }
 0x384 PF: > { %p620_p4 = scmp.ge.s32.totalorder %s724_s27, 2  ;;  %s534_s22 = sand.u32 1, %s712_s24  }
 0x385   : > { %s535_s8 = scalar_lea.sflag [#allocation3], %s534_s22 }
 0x386   : > { %p617_p7 = pnand %p620_p4, %p815_p6 }
 0x388   : > { %p618_p8 = pneg %p617_p7 }
 0x38a   : > { %707 = dma.done.wait (%p618_p8), %s535_s8, 128  }
 0x38b   : > { %709 = vsyncadd (%p618_p8), %s535_s8, 4294967168  ;;  %p17_p9 = scmp.ge.s32.totalorder %s798_s30, 4   ;;  %s925_s24 = smov %s716_s25 }
 0x38c   : > { %s926_s25 = smov %s720_s26  ;;  %s927_s26 = smov %s809_s10 }
 0x38d   : > { %s928_s27 = smov %s798_s30  ;;  %19 = sbr.rel (!%p17_p9) target bundleno = 3 (0x3), region = 83 }
 0x392   :  { %541 = vsyncpa [#allocation3], 1 }
 0x393   :  { %543 = vsyncpa [#allocation3 + $0x1], 1 }

</bundles_post_ra>
